<compile_context>
chip_gen: v7x
topology: tpu7x:2x2x1
jax: 0.10.0
libtpu: 0.0.40
codegen_flags: <defaults>
</compile_context>

<pallas_src>
import functools

import jax
import jax.numpy as jnp
from jax.experimental import pallas as pl
from jax.experimental.pallas import tpu as pltpu

HIDDEN = 768
NUM_CLASSES = 2
LANE = 128
SUBLANE = 8


def gpt2_head_kernel(x_ref, wp_ref, bp_ref, wc_ref, bc_ref, o_ref):
    """Fused pooler (Linear + tanh) and classifier Linear on one batch tile.

    x_ref : (TB, H)      bf16 last-token hidden states
    wp_ref: (H, H)       bf16 pooler weight, pre-transposed to [in, out]
    bp_ref: (1, H)       f32  pooler bias
    wc_ref: (H, Cpad)    bf16 classifier weight, [in, out], lane-padded cols
    bc_ref: (1, Cpad)    f32  classifier bias, lane-padded
    o_ref : (TB, Cpad)   f32  logits (lane-dense store; wrapper slices :C)
    """
    x = x_ref[...]                                                # (TB, H) bf16
    # pooled = tanh(x @ Wp_t + bp) — canonical MXU contraction, f32 accumulate.
    pooled = jnp.tanh(
        jnp.dot(x, wp_ref[...], preferred_element_type=jnp.float32)
        + bp_ref[...]                                             # (1, H) bcast
    )
    # Dropout (eval mode) is identity.  logits = pooled @ Wc_t + bc
    logits = (
        jnp.dot(pooled.astype(wc_ref.dtype), wc_ref[...],
                preferred_element_type=jnp.float32)
        + bc_ref[...]                                             # (1, Cpad)
    )
    o_ref[...] = logits


@functools.partial(jax.jit, static_argnames=("tile_b",))
def gpt2_classifier_head(hidden_states, wp, bp, wc, bc, *, tile_b=128):
    """hidden_states: (B, S, H) f32 backbone output.
    wp: (H, H), bp: (H,), wc: (C, H), bc: (C,) — PyTorch nn.Linear layout."""
    B, S, H = hidden_states.shape
    C = wc.shape[0]
    c_pad = max(LANE, ((C + LANE - 1) // LANE) * LANE)

    # --- glue (cheap, fused under jit; in deployment done once at load) ------
    # Last token only: the kernel never sees the (B, S, H) tensor.
    last = hidden_states[:, -1, :].astype(jnp.bfloat16)            # (B, H)
    # Pre-transpose weights to [in, out] + bf16 for the MXU; lane-pad classes.
    wp_t = wp.T.astype(jnp.bfloat16)                               # (H, H)
    wc_t = (
        jnp.zeros((H, c_pad), jnp.bfloat16)
        .at[:, :C].set(wc.T.astype(jnp.bfloat16))
    )
    bp_2d = bp.reshape(1, H).astype(jnp.float32)
    bc_2d = jnp.zeros((1, c_pad), jnp.float32).at[0, :C].set(bc.astype(jnp.float32))

    # Batch tile: multiple of 8 sublanes -> aligned, unmasked loads/stores.
    b_align = max(SUBLANE, ((B + SUBLANE - 1) // SUBLANE) * SUBLANE)
    tb = min(tile_b, b_align)
    b_pad = pl.cdiv(B, tb) * tb
    if b_pad != B:
        last = jnp.pad(last, ((0, b_pad - B), (0, 0)))
    grid = (b_pad // tb,)

    out = pl.pallas_call(
        gpt2_head_kernel,
        out_shape=jax.ShapeDtypeStruct((b_pad, c_pad), jnp.float32),
        grid_spec=pltpu.PrefetchScalarGridSpec(
            num_scalar_prefetch=0,
            grid=grid,
            in_specs=[
                pl.BlockSpec((tb, H), lambda i: (i, 0)),        # last-token tile
                pl.BlockSpec((H, H), lambda i: (0, 0)),         # pooler W (resident)
                pl.BlockSpec((1, H), lambda i: (0, 0)),         # pooler b
                pl.BlockSpec((H, c_pad), lambda i: (0, 0)),     # classifier W
                pl.BlockSpec((1, c_pad), lambda i: (0, 0)),     # classifier b
            ],
            out_specs=pl.BlockSpec((tb, c_pad), lambda i: (i, 0)),
        ),
        compiler_params=pltpu.CompilerParams(
            dimension_semantics=("parallel",),   # batch axis -> both TCs on v7x
        ),
    )(last, wp_t, bp_2d, wc_t, bc_2d)

    return out[:B, :C]


def _reference_f32(hidden_states, wp, bp, wc, bc):
    last = hidden_states[:, -1, :]
    pooled = jnp.tanh(last @ wp.T + bp)
    return pooled @ wc.T + bc


def _reference_bf16(hidden_states, wp, bp, wc, bc):
    """Matches the kernel's numerics (bf16 MXU inputs, f32 accumulate)."""
    last = hidden_states[:, -1, :].astype(jnp.bfloat16)
    pooled = jnp.tanh(
        jnp.dot(last, wp.astype(jnp.bfloat16).T,
                preferred_element_type=jnp.float32) + bp
    )
    return (
        jnp.dot(pooled.astype(jnp.bfloat16), wc.astype(jnp.bfloat16).T,
                preferred_element_type=jnp.float32) + bc
    )


if __name__ == "__main__":
    B, S, H, C = 2, 8, HIDDEN, NUM_CLASSES

    key = jax.random.PRNGKey(0)
    k_h, k_wp, k_bp, k_wc, k_bc = jax.random.split(key, 5)

    # Synthetic gpt2 backbone output (stands in for `__` in the forward).
    hidden_states = jax.random.normal(k_h, (B, S, H), dtype=jnp.float32)

    # Deterministic parameter init (PyTorch nn.Linear layout: [out, in]).
    wp = jax.random.normal(k_wp, (H, H), dtype=jnp.float32) * 0.02
    bp = jax.random.normal(k_bp, (H,), dtype=jnp.float32) * 0.02
    wc = jax.random.normal(k_wc, (C, H), dtype=jnp.float32) * 0.02
    bc = jax.random.normal(k_bc, (C,), dtype=jnp.float32) * 0.02

    logits = gpt2_classifier_head(hidden_states, wp, bp, wc, bc)
    logits = jax.block_until_ready(logits)

    assert logits.shape == (B, C)

    # Tight check vs. a bf16-emulated reference (same numerics as the kernel).
    ref_bf16 = _reference_bf16(hidden_states, wp, bp, wc, bc)
    assert jnp.allclose(logits, ref_bf16, atol=2e-3, rtol=2e-3), (
        "mismatch vs bf16 reference"
    )
    # Loose check vs. the full-f32 PyTorch-equivalent reference.
    ref_f32 = _reference_f32(hidden_states, wp, bp, wc, bc)
    assert jnp.allclose(logits, ref_f32, atol=5e-2, rtol=5e-2), (
        "mismatch vs f32 reference"
    )
    print("KERNEL_OK")
</pallas_src>

<mosaic_0001>
module attributes {stable_mosaic.version = 11 : i64} {
  func.func @gpt2_head_kernel(%arg0: i32, %arg1: memref<8x768xbf16, #tpu.memory_space<vmem>>, %arg2: memref<768x768xbf16, #tpu.memory_space<vmem>>, %arg3: memref<1x768xf32, #tpu.memory_space<vmem>>, %arg4: memref<768x128xbf16, #tpu.memory_space<vmem>>, %arg5: memref<1x128xf32, #tpu.memory_space<vmem>>, %arg6: memref<8x128xf32, #tpu.memory_space<vmem>>) attributes {dimension_semantics = [#tpu.dimension_semantics<parallel>], iteration_bounds = array<i64: 1>, scalar_prefetch = 0 : i64, scratch_operands = 0 : i64, tpu.core_type = #tpu.core_type<tc>, window_params = [{transform_indices = @transform_0, window_bounds = array<i64: 8, 768>}, {pipeline_mode = #tpu.pipeline_mode<synchronous>, transform_indices = @transform_1, window_bounds = array<i64: 768, 768>}, {pipeline_mode = #tpu.pipeline_mode<synchronous>, transform_indices = @transform_2, window_bounds = array<i64: 1, 768>}, {pipeline_mode = #tpu.pipeline_mode<synchronous>, transform_indices = @transform_3, window_bounds = array<i64: 768, 128>}, {pipeline_mode = #tpu.pipeline_mode<synchronous>, transform_indices = @transform_4, window_bounds = array<i64: 1, 128>}, {transform_indices = @transform_5, window_bounds = array<i64: 8, 128>}]} {
    %c0 = arith.constant 0 : index
    %c0_0 = arith.constant 0 : index
    %0 = vector.load %arg1[%c0, %c0_0] : memref<8x768xbf16, #tpu.memory_space<vmem>>, vector<8x768xbf16>
    %c0_1 = arith.constant 0 : index
    %c0_2 = arith.constant 0 : index
    %1 = vector.load %arg2[%c0_1, %c0_2] : memref<768x768xbf16, #tpu.memory_space<vmem>>, vector<768x768xbf16>
    %cst = arith.constant dense<0.000000e+00> : vector<8x768xf32>
    %2 = tpu.matmul %0, %1, %cst {dimension_numbers = #tpu.dot_dimension_numbers<[1], [0], [0], [1], [0, 0, 1, 1], [], []>} : vector<8x768xbf16>, vector<768x768xbf16>, vector<8x768xf32> -> vector<8x768xf32>
    %c0_3 = arith.constant 0 : index
    %c0_4 = arith.constant 0 : index
    %3 = vector.load %arg3[%c0_3, %c0_4] : memref<1x768xf32, #tpu.memory_space<vmem>>, vector<1x768xf32>
    %4 = vector.broadcast %3 : vector<1x768xf32> to vector<8x768xf32>
    %5 = arith.addf %2, %4 : vector<8x768xf32>
    %6 = math.tanh %5 : vector<8x768xf32>
    %7 = arith.truncf %6 : vector<8x768xf32> to vector<8x768xbf16>
    %c0_5 = arith.constant 0 : index
    %c0_6 = arith.constant 0 : index
    %8 = vector.load %arg4[%c0_5, %c0_6] : memref<768x128xbf16, #tpu.memory_space<vmem>>, vector<768x128xbf16>
    %cst_7 = arith.constant dense<0.000000e+00> : vector<8x128xf32>
    %9 = tpu.matmul %7, %8, %cst_7 {dimension_numbers = #tpu.dot_dimension_numbers<[1], [0], [0], [1], [0, 0, 1, 1], [], []>} : vector<8x768xbf16>, vector<768x128xbf16>, vector<8x128xf32> -> vector<8x128xf32>
    %c0_8 = arith.constant 0 : index
    %c0_9 = arith.constant 0 : index
    %10 = vector.load %arg5[%c0_8, %c0_9] : memref<1x128xf32, #tpu.memory_space<vmem>>, vector<1x128xf32>
    %11 = vector.broadcast %10 : vector<1x128xf32> to vector<8x128xf32>
    %12 = arith.addf %9, %11 : vector<8x128xf32>
    %c0_10 = arith.constant 0 : index
    %c0_11 = arith.constant 0 : index
    %13 = vector.load %arg6[%c0_10, %c0_11] : memref<8x128xf32, #tpu.memory_space<vmem>>, vector<8x128xf32>
    tpu.vector_store %arg6[%c0_10, %c0_11], %12 {strides = array<i32>} : memref<8x128xf32, #tpu.memory_space<vmem>>, vector<8x128xf32>,
    return
  }
  func.func @transform_0(%arg0: i32) -> (i32, i32) {
    %c0_i32 = arith.constant 0 : i32
    %c0_i32_0 = arith.constant 0 : i32
    return %arg0, %c0_i32 : i32, i32
  }
  func.func @transform_1(%arg0: i32) -> (i32, i32) {
    %c0_i32 = arith.constant 0 : i32
    %c0_i32_0 = arith.constant 0 : i32
    %c0_i32_1 = arith.constant 0 : i32
    return %c0_i32, %c0_i32_0 : i32, i32
  }
  func.func @transform_2(%arg0: i32) -> (i32, i32) {
    %c0_i32 = arith.constant 0 : i32
    %c0_i32_0 = arith.constant 0 : i32
    %c0_i32_1 = arith.constant 0 : i32
    return %c0_i32, %c0_i32_0 : i32, i32
  }
  func.func @transform_3(%arg0: i32) -> (i32, i32) {
    %c0_i32 = arith.constant 0 : i32
    %c0_i32_0 = arith.constant 0 : i32
    %c0_i32_1 = arith.constant 0 : i32
    return %c0_i32, %c0_i32_0 : i32, i32
  }
  func.func @transform_4(%arg0: i32) -> (i32, i32) {
    %c0_i32 = arith.constant 0 : i32
    %c0_i32_0 = arith.constant 0 : i32
    %c0_i32_1 = arith.constant 0 : i32
    return %c0_i32, %c0_i32_0 : i32, i32
  }
  func.func @transform_5(%arg0: i32) -> (i32, i32) {
    %c0_i32 = arith.constant 0 : i32
    %c0_i32_0 = arith.constant 0 : i32
    return %arg0, %c0_i32 : i32, i32
  }
}

</mosaic_0001>

<bundles_post_ra>
// kernel: gpt2_classifier_head.1
= control target key start
LH: loop header
LB: loop body
LE: loop exit
PB: predicated region body
PF: predicated region fallthrough
CT: control target
= control target key end

     0   :  { %s4751_s1 = inlined_call_operand.vmem [shape: bf16[768,768], index: 1, kind: input, shape index: {}]   ;;  %s4752_s0 = inlined_call_operand.vmem [shape: bf16[8,768], index: 0, kind: input, shape index: {}]   ;;  %s4753_s3 = inlined_call_operand.vmem [shape: bf16[768,128], index: 3, kind: input, shape index: {}]   ;;  %s4754_s2 = inlined_call_operand.vmem [shape: f32[1,768], index: 2, kind: input, shape index: {}]   ;;  %s4755_s4 = inlined_call_operand.vmem [shape: f32[1,128], index: 4, kind: input, shape index: {}]   ;;  %s4756_s5 = inlined_call_operand.vmem [shape: f32[8,128], index: 5, kind: output, shape index: {}]  }
   0x1   :  { %v3139_v0 = vld [vmem:[%s4751_s1 + $0x4] ss:$24 sps:$4 sm:$0xff]   ;;  %v3143_v2 = vld [vmem:[%s4751_s1] ss:$24 sps:$4 sm:$0xff]   ;;  %v3145_v4 = vld [vmem:[%s4751_s1 + $0x34] ss:$24 sps:$4 sm:$0xff]  }
   0x2   :  { %v3141_v1 = vld [vmem:[%s4751_s1 + $0x304] ss:$24 sps:$4 sm:$0xff]   ;;  %1805 = vmatprep.subr.bf16.mxu1 %v3139_v0  ;;  %v3144_v3 = vld [vmem:[%s4751_s1 + $0x300] ss:$24 sps:$4 sm:$0xff]   ;;  %v3147_v5 = vld [vmem:[%s4751_s1 + $0x334] ss:$24 sps:$4 sm:$0xff]  }
   0x3   :  { %1846 = vmatprep.subr.bf16.mxu0 %v3141_v1  ;;  %1806 = vmatpush1.bf16.msra.mxu1 %v3143_v2  ;;  %v3149_v6 = vld [vmem:[%s4751_s1 + $0x30] ss:$24 sps:$4 sm:$0xff]   ;;  %v3151_v8 = vld [vmem:[%s4751_s1 + $0x64] ss:$24 sps:$4 sm:$0xff]   ;;  %v3155_v10 = vld [vmem:[%s4751_s1 + $0x60] ss:$24 sps:$4 sm:$0xff]  }
   0x4   :  { %1847 = vmatpush1.bf16.msra.mxu0 %v3144_v3  ;;  %1807 = vmatprep.subr.bf16.mxu1 %v3145_v4  ;;  %v3150_v7 = vld [vmem:[%s4751_s1 + $0x330] ss:$24 sps:$4 sm:$0xff]   ;;  %v3153_v9 = vld [vmem:[%s4751_s1 + $0x364] ss:$24 sps:$4 sm:$0xff]   ;;  %v3156_v11 = vld [vmem:[%s4751_s1 + $0x360] ss:$24 sps:$4 sm:$0xff]  }
   0x5   :  { %1848 = vmatprep.subr.bf16.mxu0 %v3147_v5  ;;  %v3157_v12 = vld [vmem:[%s4751_s1 + $0x94] ss:$24 sps:$4 sm:$0xff]   ;;  %v3161_v14 = vld [vmem:[%s4751_s1 + $0x90] ss:$24 sps:$4 sm:$0xff]   ;;  %v3163_v16 = vld [vmem:[%s4751_s1 + $0xc4] ss:$24 sps:$4 sm:$0xff]  }
   0x6   :  { %v3159_v13 = vld [vmem:[%s4751_s1 + $0x394] ss:$24 sps:$4 sm:$0xff]   ;;  %v3162_v15 = vld [vmem:[%s4751_s1 + $0x390] ss:$24 sps:$4 sm:$0xff]   ;;  %v3165_v17 = vld [vmem:[%s4751_s1 + $0x3c4] ss:$24 sps:$4 sm:$0xff]  }
   0x7   :  { %1808 = vmatpush1.bf16.msra.mxu1 %v3149_v6  ;;  %v3167_v18 = vld [vmem:[%s4751_s1 + $0xc0] ss:$24 sps:$4 sm:$0xff]   ;;  %v3169_v20 = vld [vmem:[%s4751_s1 + $0xf4] ss:$24 sps:$4 sm:$0xff]   ;;  %v3173_v22 = vld [vmem:[%s4751_s1 + $0xf0] ss:$24 sps:$4 sm:$0xff]  }
   0x8   :  { %1849 = vmatpush1.bf16.msra.mxu0 %v3150_v7  ;;  %1809 = vmatprep.subr.bf16.mxu1 %v3151_v8  ;;  %v3168_v19 = vld [vmem:[%s4751_s1 + $0x3c0] ss:$24 sps:$4 sm:$0xff]   ;;  %v3171_v21 = vld [vmem:[%s4751_s1 + $0x3f4] ss:$24 sps:$4 sm:$0xff]   ;;  %v3174_v23 = vld [vmem:[%s4751_s1 + $0x3f0] ss:$24 sps:$4 sm:$0xff]  }
   0x9   :  { %1850 = vmatprep.subr.bf16.mxu0 %v3153_v9  ;;  %v3175_v24 = vld [vmem:[%s4751_s1 + $0x124] ss:$24 sps:$4 sm:$0xff]   ;;  %v3179_v26 = vld [vmem:[%s4751_s1 + $0x120] ss:$24 sps:$4 sm:$0xff]   ;;  %v3181_v28 = vld [vmem:[%s4751_s1 + $0x154] ss:$24 sps:$4 sm:$0xff]  }
   0xa   :  { %v3177_v25 = vld [vmem:[%s4751_s1 + $0x424] ss:$24 sps:$4 sm:$0xff]   ;;  %v3180_v27 = vld [vmem:[%s4751_s1 + $0x420] ss:$24 sps:$4 sm:$0xff]   ;;  %v3183_v29 = vld [vmem:[%s4751_s1 + $0x454] ss:$24 sps:$4 sm:$0xff]  }
   0xb   :  { %1810 = vmatpush1.bf16.msra.mxu1 %v3155_v10  ;;  %v3185_v30 = vld [vmem:[%s4751_s1 + $0x150] ss:$24 sps:$4 sm:$0xff]   ;;  %v3187_v32 = vld [vmem:[%s4751_s1 + $0x184] ss:$24 sps:$4 sm:$0xff]   ;;  %v3191_v34 = vld [vmem:[%s4751_s1 + $0x180] ss:$24 sps:$4 sm:$0xff]  }
   0xc   :  { %1851 = vmatpush1.bf16.msra.mxu0 %v3156_v11  ;;  %1811 = vmatprep.subr.bf16.mxu1 %v3157_v12  ;;  %v3186_v31 = vld [vmem:[%s4751_s1 + $0x450] ss:$24 sps:$4 sm:$0xff]   ;;  %v3189_v33 = vld [vmem:[%s4751_s1 + $0x484] ss:$24 sps:$4 sm:$0xff]   ;;  %v3192_v35 = vld [vmem:[%s4751_s1 + $0x480] ss:$24 sps:$4 sm:$0xff]  }
   0xd   :  { %1852 = vmatprep.subr.bf16.mxu0 %v3159_v13  ;;  %v3193_v36 = vld [vmem:[%s4751_s1 + $0x1b4] ss:$24 sps:$4 sm:$0xff]   ;;  %v3197_v38 = vld [vmem:[%s4751_s1 + $0x1b0] ss:$24 sps:$4 sm:$0xff]   ;;  %v3199_v40 = vld [vmem:[%s4751_s1 + $0x1e4] ss:$24 sps:$4 sm:$0xff]  }
   0xe   :  { %v3195_v37 = vld [vmem:[%s4751_s1 + $0x4b4] ss:$24 sps:$4 sm:$0xff]   ;;  %v3198_v39 = vld [vmem:[%s4751_s1 + $0x4b0] ss:$24 sps:$4 sm:$0xff]   ;;  %v3201_v41 = vld [vmem:[%s4751_s1 + $0x4e4] ss:$24 sps:$4 sm:$0xff]  }
   0xf   :  { %1812 = vmatpush1.bf16.msra.mxu1 %v3161_v14  ;;  %v3203_v42 = vld [vmem:[%s4751_s1 + $0x1e0] ss:$24 sps:$4 sm:$0xff]   ;;  %v3205_v44 = vld [vmem:[%s4751_s1 + $0x214] ss:$24 sps:$4 sm:$0xff]   ;;  %v3209_v49 = vld [vmem:[%s4751_s1 + $0x210] ss:$24 sps:$4 sm:$0xff]  }
  0x10   :  { %1853 = vmatpush1.bf16.msra.mxu0 %v3162_v15  ;;  %1813 = vmatprep.subr.bf16.mxu1 %v3163_v16  ;;  %v3204_v43 = vld [vmem:[%s4751_s1 + $0x4e0] ss:$24 sps:$4 sm:$0xff]   ;;  %v3207_v45 = vld [vmem:[%s4751_s1 + $0x514] ss:$24 sps:$4 sm:$0xff]   ;;  %v3210_v50 = vld [vmem:[%s4751_s1 + $0x510] ss:$24 sps:$4 sm:$0xff]  }
  0x11   :  { %1854 = vmatprep.subr.bf16.mxu0 %v3165_v17  ;;  %v21_v46 = vld [vmem:[%s4752_s0] sm:$0xff]  ;;  %v22_v48 = vld [vmem:[%s4752_s0 + $0x8] sm:$0xff]  ;;  %v3250_v11 = vld [vmem:[%s4751_s1 + $0x3c] ss:$24 sps:$4 sm:$0xff]  }
  0x12   :  { %v3808_v47 = vcombine.high %v21_v46, %v21_v46  ;;  %v3819_v51 = vcombine.high %v22_v48, %v22_v48  ;;  %v3211_v52 = vld [vmem:[%s4751_s1 + $0x244] ss:$24 sps:$4 sm:$0xff]   ;;  %v3215_v54 = vld [vmem:[%s4751_s1 + $0x240] ss:$24 sps:$4 sm:$0xff]   ;;  %v3217_v56 = vld [vmem:[%s4751_s1 + $0x274] ss:$24 sps:$4 sm:$0xff]   ;;  %v3877_v6 = vcombine.low %v21_v46, %v21_v46  ;;  %v3879_v7 = vcombine.low %v22_v48, %v22_v48 }
  0x13   :  { %1814 = vmatpush1.bf16.msra.mxu1 %v3167_v18  ;;  %v3213_v53 = vld [vmem:[%s4751_s1 + $0x544] ss:$24 sps:$4 sm:$0xff]   ;;  %v3216_v55 = vld [vmem:[%s4751_s1 + $0x540] ss:$24 sps:$4 sm:$0xff]   ;;  %v3219_v57 = vld [vmem:[%s4751_s1 + $0x574] ss:$24 sps:$4 sm:$0xff]  }
  0x14   :  { %1855 = vmatpush1.bf16.msra.mxu0 %v3168_v19  ;;  %1815 = vmatprep.subr.bf16.mxu1 %v3169_v20  ;;  %v3221_v58 = vld [vmem:[%s4751_s1 + $0x270] ss:$24 sps:$4 sm:$0xff]   ;;  %v3223_v60 = vld [vmem:[%s4751_s1 + $0x2a4] ss:$24 sps:$4 sm:$0xff]   ;;  %v3227_v62 = vld [vmem:[%s4751_s1 + $0x2a0] ss:$24 sps:$4 sm:$0xff]  }
  0x15   :  { %1856 = vmatprep.subr.bf16.mxu0 %v3171_v21  ;;  %1837 = vmatprep.mubr.bf16.mxu1 %v3808_v47  ;;  %v3222_v59 = vld [vmem:[%s4751_s1 + $0x570] ss:$24 sps:$4 sm:$0xff]   ;;  %v3225_v61 = vld [vmem:[%s4751_s1 + $0x5a4] ss:$24 sps:$4 sm:$0xff]   ;;  %v3228_v63 = vld [vmem:[%s4751_s1 + $0x5a0] ss:$24 sps:$4 sm:$0xff]  }
  0x16   :  { %1878 = vmatprep.mubr.bf16.mxu0 %v3819_v51  ;;  %v3229_v0 = vld [vmem:[%s4751_s1 + $0x2d4] ss:$24 sps:$4 sm:$0xff]   ;;  %v3233_v2 = vld [vmem:[%s4751_s1 + $0x2d0] ss:$24 sps:$4 sm:$0xff]   ;;  %v3239_v4 = vld [vmem:[%s4751_s1 + $0x604] ss:$24 sps:$4 sm:$0xff]  }
  0x17   :  { %1816 = vmatpush1.bf16.msra.mxu1 %v3173_v22  ;;  %v3231_v1 = vld [vmem:[%s4751_s1 + $0x5d4] ss:$24 sps:$4 sm:$0xff]   ;;  %v3234_v3 = vld [vmem:[%s4751_s1 + $0x5d0] ss:$24 sps:$4 sm:$0xff]   ;;  %v3237_v8 = vld [vmem:[%s4751_s1 + $0x600] ss:$24 sps:$4 sm:$0xff]  }
  0x18   :  { %1857 = vmatpush1.bf16.msra.mxu0 %v3174_v23  ;;  %1817 = vmatprep.subr.bf16.mxu1 %v3175_v24  ;;  %v3242_v5 = vld [vmem:[%s4751_s1 + $0xc] ss:$24 sps:$4 sm:$0xff]   ;;  %v3240_v9 = vld [vmem:[%s4751_s1 + $0x8] ss:$24 sps:$4 sm:$0xff]   ;;  %v3248_v13 = vld [vmem:[%s4751_s1 + $0x38] ss:$24 sps:$4 sm:$0xff]  }
  0x19   :  { %1858 = vmatprep.subr.bf16.mxu0 %v3177_v25  ;;  %v3247_v10 = vld [vmem:[%s4751_s1 + $0x634] ss:$24 sps:$4 sm:$0xff]   ;;  %v3245_v12 = vld [vmem:[%s4751_s1 + $0x630] ss:$24 sps:$4 sm:$0xff]   ;;  %v3253_v14 = vld [vmem:[%s4751_s1 + $0x664] ss:$24 sps:$4 sm:$0xff]  }
  0x1a   :  { %v3256_v15 = vld [vmem:[%s4751_s1 + $0x6c] ss:$24 sps:$4 sm:$0xff]   ;;  %v3251_v16 = vld [vmem:[%s4751_s1 + $0x660] ss:$24 sps:$4 sm:$0xff]   ;;  %v3262_v19 = vld [vmem:[%s4751_s1 + $0x9c] ss:$24 sps:$4 sm:$0xff]  }
  0x1b   :  { %1818 = vmatpush1.bf16.msra.mxu1 %v3179_v26  ;;  %v3254_v17 = vld [vmem:[%s4751_s1 + $0x68] ss:$24 sps:$4 sm:$0xff]   ;;  %v3259_v18 = vld [vmem:[%s4751_s1 + $0x694] ss:$24 sps:$4 sm:$0xff]   ;;  %v3260_v21 = vld [vmem:[%s4751_s1 + $0x98] ss:$24 sps:$4 sm:$0xff]  }
  0x1c   :  { %1859 = vmatpush1.bf16.msra.mxu0 %v3180_v27  ;;  %1819 = vmatprep.subr.bf16.mxu1 %v3181_v28  ;;  %v3257_v20 = vld [vmem:[%s4751_s1 + $0x690] ss:$24 sps:$4 sm:$0xff]   ;;  %v3265_v22 = vld [vmem:[%s4751_s1 + $0x6c4] ss:$24 sps:$4 sm:$0xff]   ;;  %v3263_v24 = vld [vmem:[%s4751_s1 + $0x6c0] ss:$24 sps:$4 sm:$0xff]  }
  0x1d   :  { %1860 = vmatprep.subr.bf16.mxu0 %v3183_v29  ;;  %v3268_v23 = vld [vmem:[%s4751_s1 + $0xcc] ss:$24 sps:$4 sm:$0xff]   ;;  %v3266_v25 = vld [vmem:[%s4751_s1 + $0xc8] ss:$24 sps:$4 sm:$0xff]   ;;  %v3274_v27 = vld [vmem:[%s4751_s1 + $0xfc] ss:$24 sps:$4 sm:$0xff]  }
  0x1e   :  { %v3271_v26 = vld [vmem:[%s4751_s1 + $0x6f4] ss:$24 sps:$4 sm:$0xff]   ;;  %v3269_v28 = vld [vmem:[%s4751_s1 + $0x6f0] ss:$24 sps:$4 sm:$0xff]  }
  0x1f   :  { %1820 = vmatpush1.bf16.msra.mxu1 %v3185_v30  ;;  %v3272_v29 = vld [vmem:[%s4751_s1 + $0xf8] ss:$24 sps:$4 sm:$0xff]   ;;  %v3277_v30 = vld [vmem:[%s4751_s1 + $0x724] ss:$24 sps:$4 sm:$0xff]  }
  0x20   :  { %1861 = vmatpush1.bf16.msra.mxu0 %v3186_v31  ;;  %1821 = vmatprep.subr.bf16.mxu1 %v3187_v32  ;;  %v3280_v31 = vld [vmem:[%s4751_s1 + $0x12c] ss:$24 sps:$4 sm:$0xff]   ;;  %v3959_v32 = vld [vmem:[%s4752_s0 + $0x10] sm:$0xff] }
  0x21   :  { %1862 = vmatprep.subr.bf16.mxu0 %v3189_v33  ;;  %v3275_v33 = vld [vmem:[%s4751_s1 + $0x720] ss:$24 sps:$4 sm:$0xff]   ;;  %v3293_v46 = vld [vmem:[%s4751_s1 + $0x7b0] ss:$24 sps:$4 sm:$0xff]  }
  0x22   :  { %v3296_v48 = vld [vmem:[%s4751_s1 + $0x1b8] ss:$24 sps:$4 sm:$0xff]  }
  0x23   :  { %1822 = vmatpush1.bf16.msra.mxu1 %v3191_v34  ;;  %v3966_v34 = vcombine.high %v3959_v32, %v3959_v32 }
  0x24   :  { %1863 = vmatpush1.bf16.msra.mxu0 %v3192_v35  ;;  %1823 = vmatprep.subr.bf16.mxu1 %v3193_v36  ;;  %v3278_v35 = vld [vmem:[%s4751_s1 + $0x128] ss:$24 sps:$4 sm:$0xff]   ;;  %v3283_v36 = vld [vmem:[%s4751_s1 + $0x754] ss:$24 sps:$4 sm:$0xff]  }
  0x25   :  { %1864 = vmatprep.subr.bf16.mxu0 %v3195_v37  ;;  %v3286_v37 = vld [vmem:[%s4751_s1 + $0x15c] ss:$24 sps:$4 sm:$0xff]  }
  0x27   :  { %1824 = vmatpush1.bf16.msra.mxu1 %v3197_v38  ;;  %v3281_v38 = vld [vmem:[%s4751_s1 + $0x750] ss:$24 sps:$4 sm:$0xff]  }
  0x28   :  { %1865 = vmatpush1.bf16.msra.mxu0 %v3198_v39  ;;  %1825 = vmatprep.subr.bf16.mxu1 %v3199_v40  ;;  %v3284_v39 = vld [vmem:[%s4751_s1 + $0x158] ss:$24 sps:$4 sm:$0xff]   ;;  %v3289_v40 = vld [vmem:[%s4751_s1 + $0x784] ss:$24 sps:$4 sm:$0xff]  }
  0x29   :  { %1866 = vmatprep.subr.bf16.mxu0 %v3201_v41  ;;  %v3292_v41 = vld [vmem:[%s4751_s1 + $0x18c] ss:$24 sps:$4 sm:$0xff]  }
  0x2b   :  { %1826 = vmatpush1.bf16.msra.mxu1 %v3203_v42  ;;  %v3287_v42 = vld [vmem:[%s4751_s1 + $0x780] ss:$24 sps:$4 sm:$0xff]  }
  0x2c   :  { %1867 = vmatpush1.bf16.msra.mxu0 %v3204_v43  ;;  %1827 = vmatprep.subr.bf16.mxu1 %v3205_v44  ;;  %v3290_v43 = vld [vmem:[%s4751_s1 + $0x188] ss:$24 sps:$4 sm:$0xff]   ;;  %v3295_v44 = vld [vmem:[%s4751_s1 + $0x7b4] ss:$24 sps:$4 sm:$0xff]  }
  0x2d   :  { %1868 = vmatprep.subr.bf16.mxu0 %v3207_v45  ;;  %v3298_v45 = vld [vmem:[%s4751_s1 + $0x1bc] ss:$24 sps:$4 sm:$0xff]  }
  0x2f   :  { %1828 = vmatpush1.bf16.msra.mxu1 %v3209_v49  ;;  %v3301_v49 = vld [vmem:[%s4751_s1 + $0x7e4] ss:$24 sps:$4 sm:$0xff]  }
  0x30   :  { %1869 = vmatpush1.bf16.msra.mxu0 %v3210_v50  ;;  %1829 = vmatprep.subr.bf16.mxu1 %v3211_v52  ;;  %v3304_v50 = vld [vmem:[%s4751_s1 + $0x1ec] ss:$24 sps:$4 sm:$0xff]   ;;  %v3299_v52 = vld [vmem:[%s4751_s1 + $0x7e0] ss:$24 sps:$4 sm:$0xff]  }
  0x31   :  { %1870 = vmatprep.subr.bf16.mxu0 %v3213_v53  ;;  %v3302_v53 = vld [vmem:[%s4751_s1 + $0x1e8] ss:$24 sps:$4 sm:$0xff]  }
  0x33   :  { %1830 = vmatpush1.bf16.msra.mxu1 %v3215_v54  ;;  %v3307_v54 = vld [vmem:[%s4751_s1 + $0x814] ss:$24 sps:$4 sm:$0xff]  }
  0x34   :  { %1871 = vmatpush1.bf16.msra.mxu0 %v3216_v55  ;;  %1831 = vmatprep.subr.bf16.mxu1 %v3217_v56  ;;  %v3310_v55 = vld [vmem:[%s4751_s1 + $0x21c] ss:$24 sps:$4 sm:$0xff]   ;;  %v3305_v56 = vld [vmem:[%s4751_s1 + $0x810] ss:$24 sps:$4 sm:$0xff]  }
  0x35   :  { %1872 = vmatprep.subr.bf16.mxu0 %v3219_v57  ;;  %v3308_v57 = vld [vmem:[%s4751_s1 + $0x218] ss:$24 sps:$4 sm:$0xff]  }
  0x37   :  { %1832 = vmatpush1.bf16.msra.mxu1 %v3221_v58  ;;  %v3313_v58 = vld [vmem:[%s4751_s1 + $0x844] ss:$24 sps:$4 sm:$0xff]  }
  0x38   :  { %1873 = vmatpush1.bf16.msra.mxu0 %v3222_v59  ;;  %1833 = vmatprep.subr.bf16.mxu1 %v3223_v60  ;;  %v3316_v59 = vld [vmem:[%s4751_s1 + $0x24c] ss:$24 sps:$4 sm:$0xff]   ;;  %v3311_v60 = vld [vmem:[%s4751_s1 + $0x840] ss:$24 sps:$4 sm:$0xff]  }
  0x39   :  { %1874 = vmatprep.subr.bf16.mxu0 %v3225_v61  ;;  %v3314_v61 = vld [vmem:[%s4751_s1 + $0x248] ss:$24 sps:$4 sm:$0xff]  }
  0x3b   :  { %1834 = vmatpush1.bf16.msra.mxu1 %v3227_v62  ;;  %v3319_v62 = vld [vmem:[%s4751_s1 + $0x874] ss:$24 sps:$4 sm:$0xff]  }
  0x3c   :  { %1875 = vmatpush1.bf16.msra.mxu0 %v3228_v63  ;;  %1835 = vmatprep.subr.bf16.mxu1 %v3229_v0  ;;  %v3322_v63 = vld [vmem:[%s4751_s1 + $0x27c] ss:$24 sps:$4 sm:$0xff]   ;;  %v3317_v0 = vld [vmem:[%s4751_s1 + $0x870] ss:$24 sps:$4 sm:$0xff]  }
  0x3d   :  { %1876 = vmatprep.subr.bf16.mxu0 %v3231_v1  ;;  %v3320_v1 = vld [vmem:[%s4751_s1 + $0x278] ss:$24 sps:$4 sm:$0xff]  }
  0x3f   :  { %1836 = vmatpush1.bf16.msra.mxu1 %v3233_v2  ;;  %v3325_v2 = vld [vmem:[%s4751_s1 + $0x8a4] ss:$24 sps:$4 sm:$0xff]  }
  0x40   :  { %1877 = vmatpush1.bf16.msra.mxu0 %v3234_v3  ;;  %1928 = vmatprep.subr.bf16.mxu1 %v3242_v5  ;;  %v3328_v3 = vld [vmem:[%s4751_s1 + $0x2ac] ss:$24 sps:$4 sm:$0xff]   ;;  %v3326_v5 = vld [vmem:[%s4751_s1 + $0x2a8] ss:$24 sps:$4 sm:$0xff]  }
  0x41   :  { %1887 = vmatprep.subr.bf16.mxu0 %v3239_v4  ;;  %v3323_v4 = vld [vmem:[%s4751_s1 + $0x8a0] ss:$24 sps:$4 sm:$0xff]  }
  0x42   :  { %1838 = vmatmul.mubr.bf16.vlgmr.msra.gmra.mrb[0].mxu1 %v3877_v6 }
  0x43   :  { %1879 = vmatmul.mubr.bf16.vlgmr.msra.gmra.mrb[0].mxu0 %v3879_v7  ;;  %1929 = vmatpush1.bf16.msra.mxu1 %v3240_v9  ;;  %v3334_v9 = vld [vmem:[%s4751_s1 + $0x2dc] ss:$24 sps:$4 sm:$0xff]  }
  0x44   :  { %1888 = vmatpush1.bf16.msra.mxu0 %v3237_v8  ;;  %1930 = vmatprep.subr.bf16.mxu1 %v3250_v11  ;;  %v3331_v8 = vld [vmem:[%s4751_s1 + $0x8d4] ss:$24 sps:$4 sm:$0xff]   ;;  %v3332_v11 = vld [vmem:[%s4751_s1 + $0x2d8] ss:$24 sps:$4 sm:$0xff]  }
  0x45   :  { %1889 = vmatprep.subr.bf16.mxu0 %v3247_v10  ;;  %1960 = vmatprep.mubr.bf16.mxu1 %v3808_v47  ;;  %v3329_v10 = vld [vmem:[%s4751_s1 + $0x8d0] ss:$24 sps:$4 sm:$0xff]  }
  0x46   :  { %1919 = vmatprep.mubr.bf16.mxu0 %v3966_v34 }
  0x47   :  { %1931 = vmatpush1.bf16.msra.mxu1 %v3248_v13  ;;  %v3342_v13 = vld [vmem:[%s4751_s1 + $0x14] ss:$24 sps:$4 sm:$0xff]  }
  0x48   :  { %1890 = vmatpush1.bf16.msra.mxu0 %v3245_v12  ;;  %1932 = vmatprep.subr.bf16.mxu1 %v3256_v15  ;;  %v3339_v12 = vld [vmem:[%s4751_s1 + $0x30c] ss:$24 sps:$4 sm:$0xff]   ;;  %v3337_v15 = vld [vmem:[%s4751_s1 + $0x308] ss:$24 sps:$4 sm:$0xff]  }
  0x49   :  { %1891 = vmatprep.subr.bf16.mxu0 %v3253_v14  ;;  %v4088_v14 = vcombine.low %v3959_v32, %v3959_v32  ;;  %v3369_v32 = vld [vmem:[%s4751_s1 + $0x3fc] ss:$24 sps:$4 sm:$0xff]  }
  0x4b   :  { %1933 = vmatpush1.bf16.msra.mxu1 %v3254_v17  ;;  %v3345_v17 = vld [vmem:[%s4751_s1 + $0x33c] ss:$24 sps:$4 sm:$0xff]  }
  0x4c   :  { %1892 = vmatpush1.bf16.msra.mxu0 %v3251_v16  ;;  %1934 = vmatprep.subr.bf16.mxu1 %v3262_v19  ;;  %v3340_v16 = vld [vmem:[%s4751_s1 + $0x10] ss:$24 sps:$4 sm:$0xff]  }
  0x4d   :  { %1893 = vmatprep.subr.bf16.mxu0 %v3259_v18  ;;  %v3348_v18 = vld [vmem:[%s4751_s1 + $0x44] ss:$24 sps:$4 sm:$0xff]   ;;  %v3343_v19 = vld [vmem:[%s4751_s1 + $0x338] ss:$24 sps:$4 sm:$0xff]  }
  0x4f   :  { %1935 = vmatpush1.bf16.msra.mxu1 %v3260_v21  ;;  %v3351_v21 = vld [vmem:[%s4751_s1 + $0x36c] ss:$24 sps:$4 sm:$0xff]  }
  0x50   :  { %1894 = vmatpush1.bf16.msra.mxu0 %v3257_v20  ;;  %1936 = vmatprep.subr.bf16.mxu1 %v3268_v23  ;;  %v3346_v20 = vld [vmem:[%s4751_s1 + $0x40] ss:$24 sps:$4 sm:$0xff]  }
  0x51   :  { %1895 = vmatprep.subr.bf16.mxu0 %v3265_v22  ;;  %v3354_v22 = vld [vmem:[%s4751_s1 + $0x74] ss:$24 sps:$4 sm:$0xff]   ;;  %v3349_v23 = vld [vmem:[%s4751_s1 + $0x368] ss:$24 sps:$4 sm:$0xff]  }
  0x53   :  { %1937 = vmatpush1.bf16.msra.mxu1 %v3266_v25  ;;  %v3357_v25 = vld [vmem:[%s4751_s1 + $0x39c] ss:$24 sps:$4 sm:$0xff]  }
  0x54   :  { %1896 = vmatpush1.bf16.msra.mxu0 %v3263_v24  ;;  %1938 = vmatprep.subr.bf16.mxu1 %v3274_v27  ;;  %v3352_v24 = vld [vmem:[%s4751_s1 + $0x70] ss:$24 sps:$4 sm:$0xff]   ;;  %v3358_v27 = vld [vmem:[%s4751_s1 + $0xa0] ss:$24 sps:$4 sm:$0xff]  }
  0x55   :  { %1897 = vmatprep.subr.bf16.mxu0 %v3271_v26  ;;  %v3355_v26 = vld [vmem:[%s4751_s1 + $0x398] ss:$24 sps:$4 sm:$0xff]  }
  0x57   :  { %1939 = vmatpush1.bf16.msra.mxu1 %v3272_v29  ;;  %v3366_v29 = vld [vmem:[%s4751_s1 + $0xd4] ss:$24 sps:$4 sm:$0xff]  }
  0x58   :  { %1898 = vmatpush1.bf16.msra.mxu0 %v3269_v28  ;;  %1940 = vmatprep.subr.bf16.mxu1 %v3280_v31  ;;  %v3363_v28 = vld [vmem:[%s4751_s1 + $0x3cc] ss:$24 sps:$4 sm:$0xff]   ;;  %v3364_v31 = vld [vmem:[%s4751_s1 + $0xd0] ss:$24 sps:$4 sm:$0xff]  }
  0x59   :  { %1899 = vmatprep.subr.bf16.mxu0 %v3277_v30  ;;  %v3361_v30 = vld [vmem:[%s4751_s1 + $0x3c8] ss:$24 sps:$4 sm:$0xff]  }
  0x5b   :  { %1941 = vmatpush1.bf16.msra.mxu1 %v3278_v35  ;;  %v3367_v35 = vld [vmem:[%s4751_s1 + $0x3f8] ss:$24 sps:$4 sm:$0xff]  }
  0x5c   :  { %1900 = vmatpush1.bf16.msra.mxu0 %v3275_v33  ;;  %1942 = vmatprep.subr.bf16.mxu1 %v3286_v37  ;;  %v3372_v33 = vld [vmem:[%s4751_s1 + $0x104] ss:$24 sps:$4 sm:$0xff]  }
  0x5d   :  { %1901 = vmatprep.subr.bf16.mxu0 %v3283_v36  ;;  %v3370_v36 = vld [vmem:[%s4751_s1 + $0x100] ss:$24 sps:$4 sm:$0xff]   ;;  %v3375_v37 = vld [vmem:[%s4751_s1 + $0x42c] ss:$24 sps:$4 sm:$0xff]  }
  0x5f   :  { %1943 = vmatpush1.bf16.msra.mxu1 %v3284_v39  ;;  %v3373_v39 = vld [vmem:[%s4751_s1 + $0x428] ss:$24 sps:$4 sm:$0xff]  }
  0x60   :  { %1902 = vmatpush1.bf16.msra.mxu0 %v3281_v38  ;;  %1944 = vmatprep.subr.bf16.mxu1 %v3292_v41  ;;  %v3378_v38 = vld [vmem:[%s4751_s1 + $0x134] ss:$24 sps:$4 sm:$0xff]  }
  0x61   :  { %1903 = vmatprep.subr.bf16.mxu0 %v3289_v40  ;;  %v3376_v40 = vld [vmem:[%s4751_s1 + $0x130] ss:$24 sps:$4 sm:$0xff]   ;;  %v3381_v41 = vld [vmem:[%s4751_s1 + $0x45c] ss:$24 sps:$4 sm:$0xff]  }
  0x63   :  { %1945 = vmatpush1.bf16.msra.mxu1 %v3290_v43  ;;  %v3379_v43 = vld [vmem:[%s4751_s1 + $0x458] ss:$24 sps:$4 sm:$0xff]  }
  0x64   :  { %1904 = vmatpush1.bf16.msra.mxu0 %v3287_v42  ;;  %1946 = vmatprep.subr.bf16.mxu1 %v3298_v45  ;;  %v3384_v42 = vld [vmem:[%s4751_s1 + $0x164] ss:$24 sps:$4 sm:$0xff]  }
  0x65   :  { %1905 = vmatprep.subr.bf16.mxu0 %v3295_v44  ;;  %v3382_v44 = vld [vmem:[%s4751_s1 + $0x160] ss:$24 sps:$4 sm:$0xff]   ;;  %v3387_v45 = vld [vmem:[%s4751_s1 + $0x48c] ss:$24 sps:$4 sm:$0xff]  }
  0x67   :  { %1947 = vmatpush1.bf16.msra.mxu1 %v3296_v48  ;;  %v3385_v48 = vld [vmem:[%s4751_s1 + $0x488] ss:$24 sps:$4 sm:$0xff]  }
  0x68   :  { %1906 = vmatpush1.bf16.msra.mxu0 %v3293_v46  ;;  %1948 = vmatprep.subr.bf16.mxu1 %v3304_v50  ;;  %v3390_v46 = vld [vmem:[%s4751_s1 + $0x194] ss:$24 sps:$4 sm:$0xff]  }
  0x69   :  { %1907 = vmatprep.subr.bf16.mxu0 %v3301_v49  ;;  %v3388_v49 = vld [vmem:[%s4751_s1 + $0x190] ss:$24 sps:$4 sm:$0xff]   ;;  %v3393_v50 = vld [vmem:[%s4751_s1 + $0x4bc] ss:$24 sps:$4 sm:$0xff]  }
  0x6b   :  { %1949 = vmatpush1.bf16.msra.mxu1 %v3302_v53  ;;  %v3391_v53 = vld [vmem:[%s4751_s1 + $0x4b8] ss:$24 sps:$4 sm:$0xff]  }
  0x6c   :  { %1908 = vmatpush1.bf16.msra.mxu0 %v3299_v52  ;;  %1950 = vmatprep.subr.bf16.mxu1 %v3310_v55  ;;  %v3396_v52 = vld [vmem:[%s4751_s1 + $0x1c4] ss:$24 sps:$4 sm:$0xff]  }
  0x6d   :  { %1909 = vmatprep.subr.bf16.mxu0 %v3307_v54  ;;  %v3394_v54 = vld [vmem:[%s4751_s1 + $0x1c0] ss:$24 sps:$4 sm:$0xff]   ;;  %v3399_v55 = vld [vmem:[%s4751_s1 + $0x4ec] ss:$24 sps:$4 sm:$0xff]  }
  0x6f   :  { %1951 = vmatpush1.bf16.msra.mxu1 %v3308_v57  ;;  %v3397_v57 = vld [vmem:[%s4751_s1 + $0x4e8] ss:$24 sps:$4 sm:$0xff]  }
  0x70   :  { %1910 = vmatpush1.bf16.msra.mxu0 %v3305_v56  ;;  %1952 = vmatprep.subr.bf16.mxu1 %v3316_v59  ;;  %v3402_v56 = vld [vmem:[%s4751_s1 + $0x1f4] ss:$24 sps:$4 sm:$0xff]  }
  0x71   :  { %1911 = vmatprep.subr.bf16.mxu0 %v3313_v58  ;;  %v3400_v58 = vld [vmem:[%s4751_s1 + $0x1f0] ss:$24 sps:$4 sm:$0xff]   ;;  %v3405_v59 = vld [vmem:[%s4751_s1 + $0x51c] ss:$24 sps:$4 sm:$0xff]  }
  0x73   :  { %1953 = vmatpush1.bf16.msra.mxu1 %v3314_v61  ;;  %v3403_v61 = vld [vmem:[%s4751_s1 + $0x518] ss:$24 sps:$4 sm:$0xff]  }
  0x74   :  { %1912 = vmatpush1.bf16.msra.mxu0 %v3311_v60  ;;  %1954 = vmatprep.subr.bf16.mxu1 %v3322_v63  ;;  %v3408_v60 = vld [vmem:[%s4751_s1 + $0x224] ss:$24 sps:$4 sm:$0xff]  }
  0x75   :  { %1913 = vmatprep.subr.bf16.mxu0 %v3319_v62  ;;  %v3406_v62 = vld [vmem:[%s4751_s1 + $0x220] ss:$24 sps:$4 sm:$0xff]   ;;  %v3411_v63 = vld [vmem:[%s4751_s1 + $0x54c] ss:$24 sps:$4 sm:$0xff]  }
  0x77   :  { %1955 = vmatpush1.bf16.msra.mxu1 %v3320_v1  ;;  %v3409_v1 = vld [vmem:[%s4751_s1 + $0x548] ss:$24 sps:$4 sm:$0xff]  }
  0x78   :  { %1914 = vmatpush1.bf16.msra.mxu0 %v3317_v0  ;;  %1956 = vmatprep.subr.bf16.mxu1 %v3328_v3  ;;  %v3414_v0 = vld [vmem:[%s4751_s1 + $0x254] ss:$24 sps:$4 sm:$0xff]  }
  0x79   :  { %1915 = vmatprep.subr.bf16.mxu0 %v3325_v2  ;;  %v3412_v2 = vld [vmem:[%s4751_s1 + $0x250] ss:$24 sps:$4 sm:$0xff]   ;;  %v3417_v3 = vld [vmem:[%s4751_s1 + $0x57c] ss:$24 sps:$4 sm:$0xff]  }
  0x7b   :  { %1957 = vmatpush1.bf16.msra.mxu1 %v3326_v5  ;;  %v3415_v5 = vld [vmem:[%s4751_s1 + $0x578] ss:$24 sps:$4 sm:$0xff]  }
  0x7c   :  { %1916 = vmatpush1.bf16.msra.mxu0 %v3323_v4  ;;  %1958 = vmatprep.subr.bf16.mxu1 %v3334_v9  ;;  %v3420_v4 = vld [vmem:[%s4751_s1 + $0x284] ss:$24 sps:$4 sm:$0xff]  }
  0x7d   :  { %1917 = vmatprep.subr.bf16.mxu0 %v3331_v8  ;;  %v3418_v8 = vld [vmem:[%s4751_s1 + $0x280] ss:$24 sps:$4 sm:$0xff]   ;;  %v3423_v9 = vld [vmem:[%s4751_s1 + $0x5ac] ss:$24 sps:$4 sm:$0xff]  }
  0x7f   :  { %1959 = vmatpush1.bf16.msra.mxu1 %v3332_v11  ;;  %v3421_v11 = vld [vmem:[%s4751_s1 + $0x5a8] ss:$24 sps:$4 sm:$0xff]  }
  0x80   :  { %1918 = vmatpush1.bf16.msra.mxu0 %v3329_v10  ;;  %1969 = vmatprep.subr.bf16.mxu1 %v3339_v12  ;;  %v3426_v10 = vld [vmem:[%s4751_s1 + $0x2b4] ss:$24 sps:$4 sm:$0xff]   ;;  %v3424_v12 = vld [vmem:[%s4751_s1 + $0x2b0] ss:$24 sps:$4 sm:$0xff]  }
  0x81   :  { %2051 = vmatprep.subr.bf16.mxu0 %v3342_v13  ;;  %v3429_v13 = vld [vmem:[%s4751_s1 + $0x5dc] ss:$24 sps:$4 sm:$0xff]  }
  0x82   :  { %1961 = vmatmul.mubr.bf16.vlgmr.msra.gmra.mrb[4].mxu1 %v3877_v6 }
  0x83   :  { %1920 = vmatmul.mubr.bf16.vlgmr.msra.gmra.mrb[0].mxu0 %v4088_v14  ;;  %1970 = vmatpush1.bf16.msra.mxu1 %v3337_v15  ;;  %v3432_v15 = vld [vmem:[%s4751_s1 + $0x2e4] ss:$24 sps:$4 sm:$0xff]  }
  0x84   :  { %2052 = vmatpush1.bf16.msra.mxu0 %v3340_v16  ;;  %1971 = vmatprep.subr.bf16.mxu1 %v3345_v17  ;;  %v3427_v16 = vld [vmem:[%s4751_s1 + $0x5d8] ss:$24 sps:$4 sm:$0xff]  }
  0x85   :  { %2053 = vmatprep.subr.bf16.mxu0 %v3348_v18  ;;  %2001 = vmatprep.mubr.bf16.mxu1 %v3819_v51  ;;  %v3430_v17 = vld [vmem:[%s4751_s1 + $0x2e0] ss:$24 sps:$4 sm:$0xff]   ;;  %v3435_v18 = vld [vmem:[%s4751_s1 + $0x60c] ss:$24 sps:$4 sm:$0xff]  }
  0x86   :  { %2083 = vmatprep.mubr.bf16.mxu0 %v3808_v47  ;;  %v3360_v47 = vld [vmem:[%s4751_s1 + $0xa4] ss:$24 sps:$4 sm:$0xff]  }
  0x87   :  { %1972 = vmatpush1.bf16.msra.mxu1 %v3343_v19  ;;  %v3438_v19 = vld [vmem:[%s4751_s1 + $0x314] ss:$24 sps:$4 sm:$0xff]  }
  0x88   :  { %2054 = vmatpush1.bf16.msra.mxu0 %v3346_v20  ;;  %1973 = vmatprep.subr.bf16.mxu1 %v3351_v21  ;;  %v3433_v20 = vld [vmem:[%s4751_s1 + $0x608] ss:$24 sps:$4 sm:$0xff]  }
  0x89   :  { %2055 = vmatprep.subr.bf16.mxu0 %v3354_v22  ;;  %v3436_v21 = vld [vmem:[%s4751_s1 + $0x310] ss:$24 sps:$4 sm:$0xff]   ;;  %v3441_v22 = vld [vmem:[%s4751_s1 + $0x63c] ss:$24 sps:$4 sm:$0xff]  }
  0x8b   :  { %1974 = vmatpush1.bf16.msra.mxu1 %v3349_v23  ;;  %v3444_v23 = vld [vmem:[%s4751_s1 + $0x344] ss:$24 sps:$4 sm:$0xff]  }
  0x8c   :  { %2056 = vmatpush1.bf16.msra.mxu0 %v3352_v24  ;;  %1975 = vmatprep.subr.bf16.mxu1 %v3357_v25  ;;  %v3439_v24 = vld [vmem:[%s4751_s1 + $0x638] ss:$24 sps:$4 sm:$0xff]  }
  0x8d   :  { %2057 = vmatprep.subr.bf16.mxu0 %v3360_v47  ;;  %v3442_v25 = vld [vmem:[%s4751_s1 + $0x340] ss:$24 sps:$4 sm:$0xff]   ;;  %v3447_v47 = vld [vmem:[%s4751_s1 + $0x66c] ss:$24 sps:$4 sm:$0xff]  }
  0x8f   :  { %1976 = vmatpush1.bf16.msra.mxu1 %v3355_v26  ;;  %v3445_v26 = vld [vmem:[%s4751_s1 + $0x668] ss:$24 sps:$4 sm:$0xff]  }
  0x90   :  { %2058 = vmatpush1.bf16.msra.mxu0 %v3358_v27  ;;  %1977 = vmatprep.subr.bf16.mxu1 %v3363_v28  ;;  %v3448_v27 = vld [vmem:[%s4751_s1 + $0x370] ss:$24 sps:$4 sm:$0xff]   ;;  %v3453_v28 = vld [vmem:[%s4751_s1 + $0x69c] ss:$24 sps:$4 sm:$0xff]  }
  0x91   :  { %2059 = vmatprep.subr.bf16.mxu0 %v3366_v29  ;;  %v3456_v29 = vld [vmem:[%s4751_s1 + $0x3a4] ss:$24 sps:$4 sm:$0xff]  }
  0x93   :  { %1978 = vmatpush1.bf16.msra.mxu1 %v3361_v30  ;;  %v3454_v30 = vld [vmem:[%s4751_s1 + $0x3a0] ss:$24 sps:$4 sm:$0xff]  }
  0x94   :  { %2060 = vmatpush1.bf16.msra.mxu0 %v3364_v31  ;;  %1979 = vmatprep.subr.bf16.mxu1 %v3369_v32  ;;  %v3459_v31 = vld [vmem:[%s4751_s1 + $0x6cc] ss:$24 sps:$4 sm:$0xff]  }
  0x95   :  { %2061 = vmatprep.subr.bf16.mxu0 %v3372_v33  ;;  %v3462_v32 = vld [vmem:[%s4751_s1 + $0x3d4] ss:$24 sps:$4 sm:$0xff]   ;;  %v3457_v33 = vld [vmem:[%s4751_s1 + $0x6c8] ss:$24 sps:$4 sm:$0xff]  }
  0x97   :  { %1980 = vmatpush1.bf16.msra.mxu1 %v3367_v35  ;;  %v3460_v35 = vld [vmem:[%s4751_s1 + $0x3d0] ss:$24 sps:$4 sm:$0xff]  }
  0x98   :  { %2062 = vmatpush1.bf16.msra.mxu0 %v3370_v36  ;;  %1981 = vmatprep.subr.bf16.mxu1 %v3375_v37  ;;  %v3465_v36 = vld [vmem:[%s4751_s1 + $0x6fc] ss:$24 sps:$4 sm:$0xff]  }
  0x99   :  { %2063 = vmatprep.subr.bf16.mxu0 %v3378_v38  ;;  %v3468_v37 = vld [vmem:[%s4751_s1 + $0x404] ss:$24 sps:$4 sm:$0xff]   ;;  %v3463_v38 = vld [vmem:[%s4751_s1 + $0x6f8] ss:$24 sps:$4 sm:$0xff]  }
  0x9b   :  { %1982 = vmatpush1.bf16.msra.mxu1 %v3373_v39  ;;  %v3466_v39 = vld [vmem:[%s4751_s1 + $0x400] ss:$24 sps:$4 sm:$0xff]  }
  0x9c   :  { %2064 = vmatpush1.bf16.msra.mxu0 %v3376_v40  ;;  %1983 = vmatprep.subr.bf16.mxu1 %v3381_v41  ;;  %v3471_v40 = vld [vmem:[%s4751_s1 + $0x72c] ss:$24 sps:$4 sm:$0xff]  }
  0x9d   :  { %2065 = vmatprep.subr.bf16.mxu0 %v3384_v42  ;;  %v3474_v41 = vld [vmem:[%s4751_s1 + $0x434] ss:$24 sps:$4 sm:$0xff]   ;;  %v3469_v42 = vld [vmem:[%s4751_s1 + $0x728] ss:$24 sps:$4 sm:$0xff]  }
  0x9f   :  { %1984 = vmatpush1.bf16.msra.mxu1 %v3379_v43  ;;  %v3472_v43 = vld [vmem:[%s4751_s1 + $0x430] ss:$24 sps:$4 sm:$0xff]  }
  0xa0   :  { %2066 = vmatpush1.bf16.msra.mxu0 %v3382_v44  ;;  %1985 = vmatprep.subr.bf16.mxu1 %v3387_v45  ;;  %v3477_v44 = vld [vmem:[%s4751_s1 + $0x75c] ss:$24 sps:$4 sm:$0xff]  }
  0xa1   :  { %2067 = vmatprep.subr.bf16.mxu0 %v3390_v46  ;;  %v3480_v45 = vld [vmem:[%s4751_s1 + $0x464] ss:$24 sps:$4 sm:$0xff]   ;;  %v3475_v46 = vld [vmem:[%s4751_s1 + $0x758] ss:$24 sps:$4 sm:$0xff]  }
  0xa3   :  { %1986 = vmatpush1.bf16.msra.mxu1 %v3385_v48  ;;  %v3478_v48 = vld [vmem:[%s4751_s1 + $0x460] ss:$24 sps:$4 sm:$0xff]  }
  0xa4   :  { %2068 = vmatpush1.bf16.msra.mxu0 %v3388_v49  ;;  %1987 = vmatprep.subr.bf16.mxu1 %v3393_v50  ;;  %v3483_v49 = vld [vmem:[%s4751_s1 + $0x78c] ss:$24 sps:$4 sm:$0xff]  }
  0xa5   :  { %2069 = vmatprep.subr.bf16.mxu0 %v3396_v52  ;;  %v3486_v50 = vld [vmem:[%s4751_s1 + $0x494] ss:$24 sps:$4 sm:$0xff]   ;;  %v3481_v52 = vld [vmem:[%s4751_s1 + $0x788] ss:$24 sps:$4 sm:$0xff]  }
  0xa7   :  { %1988 = vmatpush1.bf16.msra.mxu1 %v3391_v53  ;;  %v3484_v53 = vld [vmem:[%s4751_s1 + $0x490] ss:$24 sps:$4 sm:$0xff]  }
  0xa8   :  { %2070 = vmatpush1.bf16.msra.mxu0 %v3394_v54  ;;  %1989 = vmatprep.subr.bf16.mxu1 %v3399_v55  ;;  %v3489_v54 = vld [vmem:[%s4751_s1 + $0x7bc] ss:$24 sps:$4 sm:$0xff]  }
  0xa9   :  { %2071 = vmatprep.subr.bf16.mxu0 %v3402_v56  ;;  %v3492_v55 = vld [vmem:[%s4751_s1 + $0x4c4] ss:$24 sps:$4 sm:$0xff]   ;;  %v3487_v56 = vld [vmem:[%s4751_s1 + $0x7b8] ss:$24 sps:$4 sm:$0xff]  }
  0xab   :  { %1990 = vmatpush1.bf16.msra.mxu1 %v3397_v57  ;;  %v3490_v57 = vld [vmem:[%s4751_s1 + $0x4c0] ss:$24 sps:$4 sm:$0xff]  }
  0xac   :  { %2072 = vmatpush1.bf16.msra.mxu0 %v3400_v58  ;;  %1991 = vmatprep.subr.bf16.mxu1 %v3405_v59  ;;  %v3495_v58 = vld [vmem:[%s4751_s1 + $0x7ec] ss:$24 sps:$4 sm:$0xff]  }
  0xad   :  { %2073 = vmatprep.subr.bf16.mxu0 %v3408_v60  ;;  %v3498_v59 = vld [vmem:[%s4751_s1 + $0x4f4] ss:$24 sps:$4 sm:$0xff]   ;;  %v3493_v60 = vld [vmem:[%s4751_s1 + $0x7e8] ss:$24 sps:$4 sm:$0xff]  }
  0xaf   :  { %1992 = vmatpush1.bf16.msra.mxu1 %v3403_v61  ;;  %v3496_v61 = vld [vmem:[%s4751_s1 + $0x4f0] ss:$24 sps:$4 sm:$0xff]  }
  0xb0   :  { %2074 = vmatpush1.bf16.msra.mxu0 %v3406_v62  ;;  %1993 = vmatprep.subr.bf16.mxu1 %v3411_v63  ;;  %v3501_v62 = vld [vmem:[%s4751_s1 + $0x81c] ss:$24 sps:$4 sm:$0xff]  }
  0xb1   :  { %2075 = vmatprep.subr.bf16.mxu0 %v3414_v0  ;;  %v3504_v63 = vld [vmem:[%s4751_s1 + $0x524] ss:$24 sps:$4 sm:$0xff]   ;;  %v3499_v0 = vld [vmem:[%s4751_s1 + $0x818] ss:$24 sps:$4 sm:$0xff]  }
  0xb3   :  { %1994 = vmatpush1.bf16.msra.mxu1 %v3409_v1  ;;  %v3502_v1 = vld [vmem:[%s4751_s1 + $0x520] ss:$24 sps:$4 sm:$0xff]  }
  0xb4   :  { %2076 = vmatpush1.bf16.msra.mxu0 %v3412_v2  ;;  %1995 = vmatprep.subr.bf16.mxu1 %v3417_v3  ;;  %v3507_v2 = vld [vmem:[%s4751_s1 + $0x84c] ss:$24 sps:$4 sm:$0xff]  }
  0xb5   :  { %2077 = vmatprep.subr.bf16.mxu0 %v3420_v4  ;;  %v3510_v3 = vld [vmem:[%s4751_s1 + $0x554] ss:$24 sps:$4 sm:$0xff]   ;;  %v3505_v4 = vld [vmem:[%s4751_s1 + $0x848] ss:$24 sps:$4 sm:$0xff]  }
  0xb7   :  { %1996 = vmatpush1.bf16.msra.mxu1 %v3415_v5  ;;  %v3508_v5 = vld [vmem:[%s4751_s1 + $0x550] ss:$24 sps:$4 sm:$0xff]  }
  0xb8   :  { %2078 = vmatpush1.bf16.msra.mxu0 %v3418_v8  ;;  %1997 = vmatprep.subr.bf16.mxu1 %v3423_v9  ;;  %v3513_v8 = vld [vmem:[%s4751_s1 + $0x87c] ss:$24 sps:$4 sm:$0xff]  }
  0xb9   :  { %2079 = vmatprep.subr.bf16.mxu0 %v3426_v10  ;;  %v3516_v9 = vld [vmem:[%s4751_s1 + $0x584] ss:$24 sps:$4 sm:$0xff]   ;;  %v3511_v10 = vld [vmem:[%s4751_s1 + $0x878] ss:$24 sps:$4 sm:$0xff]  }
  0xbb   :  { %1998 = vmatpush1.bf16.msra.mxu1 %v3421_v11  ;;  %v3514_v11 = vld [vmem:[%s4751_s1 + $0x580] ss:$24 sps:$4 sm:$0xff]  }
  0xbc   :  { %2080 = vmatpush1.bf16.msra.mxu0 %v3424_v12  ;;  %1999 = vmatprep.subr.bf16.mxu1 %v3429_v13  ;;  %v3519_v12 = vld [vmem:[%s4751_s1 + $0x8ac] ss:$24 sps:$4 sm:$0xff]  }
  0xbd   :  { %2081 = vmatprep.subr.bf16.mxu0 %v3432_v15  ;;  %v3522_v13 = vld [vmem:[%s4751_s1 + $0x5b4] ss:$24 sps:$4 sm:$0xff]   ;;  %v3517_v15 = vld [vmem:[%s4751_s1 + $0x8a8] ss:$24 sps:$4 sm:$0xff]  }
  0xbf   :  { %2000 = vmatpush1.bf16.msra.mxu1 %v3427_v16  ;;  %v3520_v16 = vld [vmem:[%s4751_s1 + $0x5b0] ss:$24 sps:$4 sm:$0xff]  }
  0xc0   :  { %2082 = vmatpush1.bf16.msra.mxu0 %v3430_v17  ;;  %2010 = vmatprep.subr.bf16.mxu1 %v3435_v18  ;;  %v3525_v17 = vld [vmem:[%s4751_s1 + $0x8dc] ss:$24 sps:$4 sm:$0xff]  }
  0xc1   :  { %2092 = vmatprep.subr.bf16.mxu0 %v3438_v19  ;;  %v3528_v18 = vld [vmem:[%s4751_s1 + $0x5e4] ss:$24 sps:$4 sm:$0xff]   ;;  %v3523_v19 = vld [vmem:[%s4751_s1 + $0x8d8] ss:$24 sps:$4 sm:$0xff]  }
  0xc2   :  { %2002 = vmatmul.mubr.bf16.vlgmr.msra.gmra.mrb[4].mxu1 %v3879_v7 }
  0xc3   :  { %2084 = vmatmul.mubr.bf16.vlgmr.msra.gmra.mrb[4].mxu0 %v3877_v6  ;;  %2011 = vmatpush1.bf16.msra.mxu1 %v3433_v20  ;;  %v3450_v6 = vld [vmem:[%s4751_s1 + $0x374] ss:$24 sps:$4 sm:$0xff]   ;;  %v3526_v20 = vld [vmem:[%s4751_s1 + $0x5e0] ss:$24 sps:$4 sm:$0xff]  }
  0xc4   :  { %2093 = vmatpush1.bf16.msra.mxu0 %v3436_v21  ;;  %2012 = vmatprep.subr.bf16.mxu1 %v3441_v22  ;;  %v3531_v21 = vld [vmem:[%s4751_s1 + $0x614] ss:$24 sps:$4 sm:$0xff]   ;;  %v3577_v22 = vld [vmem:[%s4753_s3 + $0x40] sm:$0xff]  }
  0xc5   :  { %2094 = vmatprep.subr.bf16.mxu0 %v3444_v23  ;;  %2042 = vmatprep.mubr.bf16.mxu1 %v3966_v34  ;;  %v3529_v23 = vld [vmem:[%s4751_s1 + $0x610] ss:$24 sps:$4 sm:$0xff]  }
  0xc6   :  { %2124 = vmatprep.mubr.bf16.mxu0 %v3819_v51  ;;  %v3451_v51 = vld [vmem:[%s4751_s1 + $0x698] ss:$24 sps:$4 sm:$0xff]  }
  0xc7   :  { %2013 = vmatpush1.bf16.msra.mxu1 %v3439_v24  ;;  %v3534_v24 = vld [vmem:[%s4751_s1 + $0x644] ss:$24 sps:$4 sm:$0xff]  }
  0xc8   :  { %2095 = vmatpush1.bf16.msra.mxu0 %v3442_v25  ;;  %2014 = vmatprep.subr.bf16.mxu1 %v3447_v47  ;;  %v3578_v25 = vld [vmem:[%s4753_s3] sm:$0xff]   ;;  %v3579_v47 = vld [vmem:[%s4753_s3 + $0x48] sm:$0xff]  }
  0xc9   :  { %2096 = vmatprep.subr.bf16.mxu0 %v3450_v6  ;;  %v3532_v6 = vld [vmem:[%s4751_s1 + $0x640] ss:$24 sps:$4 sm:$0xff]  }
  0xcb   :  { %2015 = vmatpush1.bf16.msra.mxu1 %v3445_v26  ;;  %v3537_v26 = vld [vmem:[%s4751_s1 + $0x674] ss:$24 sps:$4 sm:$0xff]  }
  0xcc   :  { %2097 = vmatpush1.bf16.msra.mxu0 %v3448_v27  ;;  %2016 = vmatprep.subr.bf16.mxu1 %v3453_v28  ;;  %v3580_v27 = vld [vmem:[%s4753_s3 + $0x8] sm:$0xff]   ;;  %v3540_v28 = vld [vmem:[%s4751_s1 + $0x6a4] ss:$24 sps:$4 sm:$0xff]  }
  0xcd   :  { %2098 = vmatprep.subr.bf16.mxu0 %v3456_v29  ;;  %v3582_v29 = vld [vmem:[%s4753_s3 + $0x10] sm:$0xff]  }
  0xcf   :  { %2017 = vmatpush1.bf16.msra.mxu1 %v3451_v51  ;;  %v3583_v51 = vld [vmem:[%s4753_s3 + $0x58] sm:$0xff]  }
  0xd0   :  { %2099 = vmatpush1.bf16.msra.mxu0 %v3454_v30  ;;  %2018 = vmatprep.subr.bf16.mxu1 %v3459_v31  ;;  %v3538_v30 = vld [vmem:[%s4751_s1 + $0x6a0] ss:$24 sps:$4 sm:$0xff]   ;;  %v3543_v31 = vld [vmem:[%s4751_s1 + $0x6d4] ss:$24 sps:$4 sm:$0xff]  }
  0xd1   :  { %2100 = vmatprep.subr.bf16.mxu0 %v3462_v32  ;;  %v3584_v32 = vld [vmem:[%s4753_s3 + $0x18] sm:$0xff]  }
  0xd3   :  { %2019 = vmatpush1.bf16.msra.mxu1 %v3457_v33  ;;  %v3585_v33 = vld [vmem:[%s4753_s3 + $0x60] sm:$0xff]  }
  0xd4   :  { %2101 = vmatpush1.bf16.msra.mxu0 %v3460_v35  ;;  %2020 = vmatprep.subr.bf16.mxu1 %v3465_v36  ;;  %v3541_v35 = vld [vmem:[%s4751_s1 + $0x6d0] ss:$24 sps:$4 sm:$0xff]   ;;  %v3546_v36 = vld [vmem:[%s4751_s1 + $0x704] ss:$24 sps:$4 sm:$0xff]  }
  0xd5   :  { %2102 = vmatprep.subr.bf16.mxu0 %v3468_v37  ;;  %v3586_v37 = vld [vmem:[%s4753_s3 + $0x20] sm:$0xff]  }
  0xd7   :  { %2021 = vmatpush1.bf16.msra.mxu1 %v3463_v38  ;;  %v3587_v38 = vld [vmem:[%s4753_s3 + $0x68] sm:$0xff]  }
  0xd8   :  { %2103 = vmatpush1.bf16.msra.mxu0 %v3466_v39  ;;  %2022 = vmatprep.subr.bf16.mxu1 %v3471_v40  ;;  %v3544_v39 = vld [vmem:[%s4751_s1 + $0x700] ss:$24 sps:$4 sm:$0xff]   ;;  %v3549_v40 = vld [vmem:[%s4751_s1 + $0x734] ss:$24 sps:$4 sm:$0xff]  }
  0xd9   :  { %2104 = vmatprep.subr.bf16.mxu0 %v3474_v41  ;;  %v3588_v41 = vld [vmem:[%s4753_s3 + $0x28] sm:$0xff]  }
  0xdb   :  { %2023 = vmatpush1.bf16.msra.mxu1 %v3469_v42 }
  0xdc   :  { %2105 = vmatpush1.bf16.msra.mxu0 %v3472_v43  ;;  %2024 = vmatprep.subr.bf16.mxu1 %v3477_v44  ;;  %v3589_v43 = vld [vmem:[%s4753_s3 + $0x70] sm:$0xff]  }
  0xdd   :  { %2106 = vmatprep.subr.bf16.mxu0 %v3480_v45  ;;  %v3547_v45 = vld [vmem:[%s4751_s1 + $0x730] ss:$24 sps:$4 sm:$0xff]  }
  0xdf   :  { %2025 = vmatpush1.bf16.msra.mxu1 %v3475_v46 }
  0xe0   :  { %2107 = vmatpush1.bf16.msra.mxu0 %v3478_v48  ;;  %2026 = vmatprep.subr.bf16.mxu1 %v3483_v49  ;;  %v3552_v48 = vld [vmem:[%s4751_s1 + $0x764] ss:$24 sps:$4 sm:$0xff]  }
  0xe1   :  { %2108 = vmatprep.subr.bf16.mxu0 %v3486_v50  ;;  %v3590_v50 = vld [vmem:[%s4753_s3 + $0x30] sm:$0xff]  }
  0xe3   :  { %2027 = vmatpush1.bf16.msra.mxu1 %v3481_v52  ;;  %v3591_v52 = vld [vmem:[%s4753_s3 + $0x78] sm:$0xff]  }
  0xe4   :  { %2109 = vmatpush1.bf16.msra.mxu0 %v3484_v53  ;;  %2028 = vmatprep.subr.bf16.mxu1 %v3489_v54  ;;  %v3550_v53 = vld [vmem:[%s4751_s1 + $0x760] ss:$24 sps:$4 sm:$0xff]   ;;  %v3555_v54 = vld [vmem:[%s4751_s1 + $0x794] ss:$24 sps:$4 sm:$0xff]  }
  0xe5   :  { %2110 = vmatprep.subr.bf16.mxu0 %v3492_v55  ;;  %v3592_v55 = vld [vmem:[%s4753_s3 + $0x38] sm:$0xff]  }
  0xe7   :  { %2029 = vmatpush1.bf16.msra.mxu1 %v3487_v56  ;;  %v3593_v56 = vld [vmem:[%s4753_s3 + $0xc0] sm:$0xff]  }
  0xe8   :  { %2111 = vmatpush1.bf16.msra.mxu0 %v3490_v57  ;;  %2030 = vmatprep.subr.bf16.mxu1 %v3495_v58  ;;  %v3553_v57 = vld [vmem:[%s4751_s1 + $0x790] ss:$24 sps:$4 sm:$0xff]   ;;  %v3558_v58 = vld [vmem:[%s4751_s1 + $0x7c4] ss:$24 sps:$4 sm:$0xff]  }
  0xe9   :  { %2112 = vmatprep.subr.bf16.mxu0 %v3498_v59  ;;  %v3556_v59 = vld [vmem:[%s4751_s1 + $0x7c0] ss:$24 sps:$4 sm:$0xff]  }
  0xeb   :  { %2031 = vmatpush1.bf16.msra.mxu1 %v3493_v60  ;;  %v3561_v60 = vld [vmem:[%s4751_s1 + $0x7f4] ss:$24 sps:$4 sm:$0xff]  }
  0xec   :  { %2113 = vmatpush1.bf16.msra.mxu0 %v3496_v61  ;;  %2032 = vmatprep.subr.bf16.mxu1 %v3501_v62  ;;  %v3559_v61 = vld [vmem:[%s4751_s1 + $0x7f0] ss:$24 sps:$4 sm:$0xff]   ;;  %v3564_v62 = vld [vmem:[%s4751_s1 + $0x824] ss:$24 sps:$4 sm:$0xff]  }
  0xed   :  { %2114 = vmatprep.subr.bf16.mxu0 %v3504_v63  ;;  %v3562_v63 = vld [vmem:[%s4751_s1 + $0x820] ss:$24 sps:$4 sm:$0xff]  }
  0xef   :  { %2033 = vmatpush1.bf16.msra.mxu1 %v3499_v0  ;;  %v3567_v0 = vld [vmem:[%s4751_s1 + $0x854] ss:$24 sps:$4 sm:$0xff]  }
  0xf0   :  { %2115 = vmatpush1.bf16.msra.mxu0 %v3502_v1  ;;  %2034 = vmatprep.subr.bf16.mxu1 %v3507_v2  ;;  %v3565_v1 = vld [vmem:[%s4751_s1 + $0x850] ss:$24 sps:$4 sm:$0xff]   ;;  %v3570_v2 = vld [vmem:[%s4751_s1 + $0x884] ss:$24 sps:$4 sm:$0xff]  }
  0xf1   :  { %2116 = vmatprep.subr.bf16.mxu0 %v3510_v3  ;;  %v3568_v3 = vld [vmem:[%s4751_s1 + $0x880] ss:$24 sps:$4 sm:$0xff]  }
  0xf3   :  { %2035 = vmatpush1.bf16.msra.mxu1 %v3505_v4  ;;  %v3573_v4 = vld [vmem:[%s4751_s1 + $0x8b4] ss:$24 sps:$4 sm:$0xff]  }
  0xf4   :  { %2117 = vmatpush1.bf16.msra.mxu0 %v3508_v5  ;;  %2036 = vmatprep.subr.bf16.mxu1 %v3513_v8  ;;  %v3571_v5 = vld [vmem:[%s4751_s1 + $0x8b0] ss:$24 sps:$4 sm:$0xff]   ;;  %v3576_v8 = vld [vmem:[%s4751_s1 + $0x8e4] ss:$24 sps:$4 sm:$0xff]  }
  0xf5   :  { %2118 = vmatprep.subr.bf16.mxu0 %v3516_v9  ;;  %v3574_v9 = vld [vmem:[%s4751_s1 + $0x8e0] ss:$24 sps:$4 sm:$0xff]  }
  0xf7   :  { %2037 = vmatpush1.bf16.msra.mxu1 %v3511_v10  ;;  %v314_v10 = vlaneseq }
  0xf8   :  { %2119 = vmatpush1.bf16.msra.mxu0 %v3514_v11  ;;  %2038 = vmatprep.subr.bf16.mxu1 %v3519_v12 }
  0xf9   :  { %2120 = vmatprep.subr.bf16.mxu0 %v3522_v13  ;;  %v4631_v11 = vshrl.u32 %v314_v10, 7  ;;  %v4637_v13 = vld [vmem:[%s4754_s2] sm:$0x3f] }
  0xfb   :  { %2039 = vmatpush1.bf16.msra.mxu1 %v3517_v15  ;;  %v316_v12 = vsub.s32 0, %v4631_v11  ;;  %v320_v15 = vsub.s32 1, %v4631_v11  ;;  %v332_v10 = vsub.s32 4, %v4631_v11 }
  0xfc   :  { %2121 = vmatpush1.bf16.msra.mxu0 %v3520_v16  ;;  %2040 = vmatprep.subr.bf16.mxu1 %v3525_v17 }
  0xfd   :  { %2122 = vmatprep.subr.bf16.mxu0 %v3528_v18  ;;  %v317_v16 = vrot.slane %v4637_v13, %v316_v12  ;;  %v321_v17 = vrot.slane %v4637_v13, %v320_v15  ;;  %v336_v12 = vsub.s32 5, %v4631_v11  ;;  %v333_v15 = vrot.slane %v4637_v13, %v332_v10 }
  0xff   :  { %2041 = vmatpush1.bf16.msra.mxu1 %v3523_v19 }
 0x100   :  { %2123 = vmatpush1.bf16.msra.mxu0 %v3526_v20  ;;  %3045 = vmatprep.subr.bf16.mxu1 %v3577_v22 }
 0x101   :  { %2133 = vmatprep.subr.bf16.mxu0 %v3531_v21 }
 0x102   :  { %2043 = vmatmul.mubr.bf16.vlgmr.msra.gmra.mrb[4].mxu1 %v4088_v14 }
 0x103   :  { %2125 = vmatmul.mubr.bf16.vlgmr.msra.gmra.mrb[4].mxu0 %v3879_v7  ;;  %3046 = vmatpush3.bf16.msra.mxu1 %v3578_v25  ;;  %v3581_v7 = vld [vmem:[%s4753_s3 + $0x50] sm:$0xff]  }
 0x104   :  { %2134 = vmatpush1.bf16.msra.mxu0 %v3529_v23  ;;  %2165 = vmatprep.mubr.bf16.mxu0 %v3966_v34  ;;  %v3535_v34 = vld [vmem:[%s4751_s1 + $0x670] ss:$24 sps:$4 sm:$0xff]  }
 0x105   :  { %2135 = vmatprep.subr.bf16.mxu0 %v3534_v24  ;;  %3047 = vmatprep.subr.bf16.mxu1 %v3579_v47 }
 0x107   :  { %3048 = vmatpush3.bf16.msra.mxu1 %v3580_v27 }
 0x108   :  { %2136 = vmatpush1.bf16.msra.mxu0 %v3532_v6  ;;  %3049 = vmatprep.subr.bf16.mxu1 %v3581_v7  ;;  %v3595_v7 = vld [vmem:[%s4753_s3 + $0xc8] sm:$0xff]  }
 0x109   :  { %2137 = vmatprep.subr.bf16.mxu0 %v3537_v26  ;;  %v3594_v26 = vld [vmem:[%s4753_s3 + $0x80] sm:$0xff]  }
 0x10b   :  { %3050 = vmatpush3.bf16.msra.mxu1 %v3582_v29  ;;  %v3598_v29 = vld [vmem:[%s4753_s3 + $0x90] sm:$0xff]  }
 0x10c   :  { %2138 = vmatpush1.bf16.msra.mxu0 %v3535_v34  ;;  %3051 = vmatprep.subr.bf16.mxu1 %v3583_v51  ;;  %v3596_v34 = vld [vmem:[%s4753_s3 + $0x88] sm:$0xff]   ;;  %v3599_v51 = vld [vmem:[%s4753_s3 + $0xd8] sm:$0xff]  }
 0x10d   :  { %2139 = vmatprep.subr.bf16.mxu0 %v3540_v28  ;;  %v3597_v28 = vld [vmem:[%s4753_s3 + $0xd0] sm:$0xff]  }
 0x10f   :  { %3052 = vmatpush3.bf16.msra.mxu1 %v3584_v32  ;;  %v3602_v32 = vld [vmem:[%s4753_s3 + $0xa0] sm:$0xff]  }
 0x110   :  { %2140 = vmatpush1.bf16.msra.mxu0 %v3538_v30  ;;  %3053 = vmatprep.subr.bf16.mxu1 %v3585_v33  ;;  %v3600_v30 = vld [vmem:[%s4753_s3 + $0x98] sm:$0xff]   ;;  %v3603_v33 = vld [vmem:[%s4753_s3 + $0xe8] sm:$0xff]  }
 0x111   :  { %2141 = vmatprep.subr.bf16.mxu0 %v3543_v31  ;;  %v3601_v31 = vld [vmem:[%s4753_s3 + $0xe0] sm:$0xff]  }
 0x113   :  { %3054 = vmatpush3.bf16.msra.mxu1 %v3586_v37  ;;  %v3606_v37 = vld [vmem:[%s4753_s3 + $0xb0] sm:$0xff]  }
 0x114   :  { %2142 = vmatpush1.bf16.msra.mxu0 %v3541_v35  ;;  %3055 = vmatprep.subr.bf16.mxu1 %v3587_v38  ;;  %v3604_v35 = vld [vmem:[%s4753_s3 + $0xa8] sm:$0xff]   ;;  %v3607_v38 = vld [vmem:[%s4753_s3 + $0xf8] sm:$0xff]  }
 0x115   :  { %2143 = vmatprep.subr.bf16.mxu0 %v3546_v36  ;;  %v4554_v42 = vpop.f32.mrb[0].mxu1  ;;  %v3605_v36 = vld [vmem:[%s4753_s3 + $0xf0] sm:$0xff]  }
 0x116   :  { %v4559_v44 = vpop.f32.mrb[1].mxu1  ;;  %v1840_v18 = vadd.f32 %v4554_v42, %v317_v16  ;;  %v328_v42 = vsub.s32 3, %v4631_v11  ;;  %v337_v16 = vrot.slane %v4637_v13, %v336_v12 }
 0x117   :  { %v1843_v46 = vpop.f32.mrb[2].mxu1  ;;  %3056 = vmatpush3.bf16.msra.mxu1 %v3588_v41  ;;  %v324_v41 = vsub.s32 2, %v4631_v11 }
 0x118   :  { %2144 = vmatpush1.bf16.msra.mxu0 %v3544_v39  ;;  %v1844_v49 = vpop.f32.mrb[3].mxu1  ;;  %3057 = vmatprep.subr.bf16.mxu1 %v3589_v43  ;;  %v3608_v39 = vld [vmem:[%s4753_s3 + $0xb8] sm:$0xff]  }
 0x119   :  { %2145 = vmatprep.subr.bf16.mxu0 %v3549_v40  ;;  %v3609_v40 = vld [vmem:[%s4753_s3 + $0x140] sm:$0xff]   ;;  %v325_v43 = vrot.slane %v4637_v13, %v324_v41 }
 0x11b   :  { %3058 = vmatpush3.bf16.msra.mxu1 %v3590_v50 }
 0x11c   :  { %2146 = vmatpush1.bf16.msra.mxu0 %v3547_v45  ;;  %3059 = vmatprep.subr.bf16.mxu1 %v3591_v52 }
 0x11d   :  { %2147 = vmatprep.subr.bf16.mxu0 %v3552_v48 }
 0x11f   :  { %3060 = vmatpush3.bf16.msra.mxu1 %v3592_v55 }
 0x120   :  { %2148 = vmatpush1.bf16.msra.mxu0 %v3550_v53  ;;  %3067 = vmatprep.subr.bf16.mxu1 %v3593_v56  ;;  %v3610_v56 = vld [vmem:[%s4753_s3 + $0x100] sm:$0xff]  }
 0x121   :  { %2149 = vmatprep.subr.bf16.mxu0 %v3555_v54 }
 0x124   :  { %2150 = vmatpush1.bf16.msra.mxu0 %v3553_v57 }
 0x125   :  { %2151 = vmatprep.subr.bf16.mxu0 %v3558_v58  ;;  %v3611_v58 = vld [vmem:[%s4753_s3 + $0x148] sm:$0xff]  }
 0x128   :  { %2152 = vmatpush1.bf16.msra.mxu0 %v3556_v59  ;;  %v3612_v59 = vld [vmem:[%s4753_s3 + $0x108] sm:$0xff]  }
 0x129   :  { %2153 = vmatprep.subr.bf16.mxu0 %v3561_v60  ;;  %v3613_v60 = vld [vmem:[%s4753_s3 + $0x150] sm:$0xff]  }
 0x12c   :  { %2154 = vmatpush1.bf16.msra.mxu0 %v3559_v61  ;;  %v3614_v61 = vld [vmem:[%s4753_s3 + $0x110] sm:$0xff]  }
 0x12d   :  { %2155 = vmatprep.subr.bf16.mxu0 %v3564_v62  ;;  %v3615_v62 = vld [vmem:[%s4753_s3 + $0x158] sm:$0xff]  }
 0x130   :  { %2156 = vmatpush1.bf16.msra.mxu0 %v3562_v63  ;;  %v3616_v63 = vld [vmem:[%s4753_s3 + $0x118] sm:$0xff]  }
 0x131   :  { %2157 = vmatprep.subr.bf16.mxu0 %v3567_v0  ;;  %v3617_v0 = vld [vmem:[%s4753_s3 + $0x160] sm:$0xff]  }
 0x134   :  { %2158 = vmatpush1.bf16.msra.mxu0 %v3565_v1  ;;  %v3618_v1 = vld [vmem:[%s4753_s3 + $0x120] sm:$0xff]  }
 0x135   :  { %2159 = vmatprep.subr.bf16.mxu0 %v3570_v2  ;;  %v3619_v2 = vld [vmem:[%s4753_s3 + $0x168] sm:$0xff]  }
 0x138   :  { %2160 = vmatpush1.bf16.msra.mxu0 %v3568_v3  ;;  %v3620_v3 = vld [vmem:[%s4753_s3 + $0x128] sm:$0xff]  }
 0x139   :  { %2161 = vmatprep.subr.bf16.mxu0 %v3573_v4  ;;  %v3621_v4 = vld [vmem:[%s4753_s3 + $0x170] sm:$0xff]  }
 0x13c   :  { %2162 = vmatpush1.bf16.msra.mxu0 %v3571_v5  ;;  %v3622_v5 = vld [vmem:[%s4753_s3 + $0x130] sm:$0xff]  }
 0x13d   :  { %2163 = vmatprep.subr.bf16.mxu0 %v3576_v8  ;;  %v3623_v8 = vld [vmem:[%s4753_s3 + $0x178] sm:$0xff]  }
 0x140   :  { %2164 = vmatpush1.bf16.msra.mxu0 %v3574_v9  ;;  %v3624_v9 = vld [vmem:[%s4753_s3 + $0x138] sm:$0xff]  }
 0x143   :  { %2166 = vmatmul.mubr.bf16.vlgmr.msra.gmra.mrb[4].mxu0 %v4088_v14  ;;  %v1842_v14 = vadd.f32 %v4559_v44, %v321_v17  ;;  %v329_v44 = vrot.slane %v4637_v13, %v328_v42  ;;  %v2996_v13 = vld [vmem:[%s4755_s4] ss:$0 sm:$0xff] }
 0x156   :  { %v1921_v19 = vpop.f32.mrb[0].mxu0 }
 0x157   :  { %v3112_v20 = vadd.f32 %v1921_v19, %v1840_v18  ;;  %v1923_v21 = vpop.f32.mrb[1].mxu0 }
 0x158   :  { %v3114_v22 = vadd.f32 %v1923_v21, %v1842_v14  ;;  %v1925_v23 = vpop.f32.mrb[2].mxu0 }
 0x159   :  { %3625 = vtanh.f32 %v3112_v20  ;;  %v1926_v24 = vpop.f32.mrb[3].mxu0 }
 0x15a   :  { %3627 = vtanh.f32 %v3114_v22 }
 0x163   :  { %v3626_v25 = vpop.eup %3625 }
 0x164   :  { %v3628_v47 = vpop.eup %3627  ;;  %v2180_v27 = vpack.c.bf16 %v3626_v25, %v3626_v25 }
 0x165   :  { %v2181_v6 = vpack.c.bf16 %v3628_v47, %v3628_v47 }
 0x167   :  { %2609 = vmatprep.mubr.bf16.mxu1 %v2181_v6 }
 0x168   :  { %2610 = vmatmul.mubr.bf16.vlgmr.msra.gmra.mrb[8].mxu1 %v2180_v27 }
 0x169   :  { %3068 = vmatpush3.bf16.msra.mxu1 %v3594_v26 }
 0x16a   :  { %3069 = vmatprep.subr.bf16.mxu1 %v3595_v7 }
 0x16d   :  { %3070 = vmatpush3.bf16.msra.mxu1 %v3596_v34 }
 0x16e   :  { %3071 = vmatprep.subr.bf16.mxu1 %v3597_v28 }
 0x171   :  { %3072 = vmatpush3.bf16.msra.mxu1 %v3598_v29 }
 0x172   :  { %3073 = vmatprep.subr.bf16.mxu1 %v3599_v51 }
 0x175   :  { %3074 = vmatpush3.bf16.msra.mxu1 %v3600_v30 }
 0x176   :  { %3075 = vmatprep.subr.bf16.mxu1 %v3601_v31 }
 0x179   :  { %3076 = vmatpush3.bf16.msra.mxu1 %v3602_v32 }
 0x17a   :  { %3077 = vmatprep.subr.bf16.mxu1 %v3603_v33 }
 0x17d   :  { %3078 = vmatpush3.bf16.msra.mxu1 %v3604_v35 }
 0x17e   :  { %3079 = vmatprep.subr.bf16.mxu1 %v3605_v36 }
 0x181   :  { %3080 = vmatpush3.bf16.msra.mxu1 %v3606_v37 }
 0x182   :  { %3081 = vmatprep.subr.bf16.mxu1 %v3607_v38 }
 0x185   :  { %3082 = vmatpush3.bf16.msra.mxu1 %v3608_v39 }
 0x186   :  { %3089 = vmatprep.subr.bf16.mxu1 %v3609_v40 }
 0x1d5   :  { %v2044_v45 = vpop.f32.mrb[4].mxu1 }
 0x1d6   :  { %v3115_v46 = vadd.f32 %v2044_v45, %v325_v43  ;;  %v2046_v48 = vpop.f32.mrb[5].mxu1 }
 0x1d7   :  { %v3116_v49 = vadd.f32 %v2046_v48, %v329_v44  ;;  %v2048_v50 = vpop.f32.mrb[6].mxu1 }
 0x1d8   :  { %3629 = vtanh.f32 %v3115_v46  ;;  %v2049_v52 = vpop.f32.mrb[7].mxu1 }
 0x1d9   :  { %3631 = vtanh.f32 %v3116_v49 }
 0x1e2   :  { %v3630_v53 = vpop.eup %3629 }
 0x1e3   :  { %v3632_v54 = vpop.eup %3631  ;;  %v2182_v57 = vpack.c.bf16 %v3630_v53, %v3630_v53 }
 0x1e4   :  { %v2183_v55 = vpack.c.bf16 %v3632_v54, %v3632_v54 }
 0x1e6   :  { %2649 = vmatprep.mubr.bf16.mxu1 %v2183_v55 }
 0x1e7   :  { %2650 = vmatmul.mubr.bf16.vlgmr.msra.gmra.mrb[12].mxu1 %v2182_v57 }
 0x1e8   :  { %3090 = vmatpush3.bf16.msra.mxu1 %v3610_v56 }
 0x1e9   :  { %3091 = vmatprep.subr.bf16.mxu1 %v3611_v58 }
 0x1ec   :  { %3092 = vmatpush3.bf16.msra.mxu1 %v3612_v59 }
 0x1ed   :  { %3093 = vmatprep.subr.bf16.mxu1 %v3613_v60 }
 0x1f0   :  { %3094 = vmatpush3.bf16.msra.mxu1 %v3614_v61 }
 0x1f1   :  { %3095 = vmatprep.subr.bf16.mxu1 %v3615_v62 }
 0x1f4   :  { %3096 = vmatpush3.bf16.msra.mxu1 %v3616_v63 }
 0x1f5   :  { %3097 = vmatprep.subr.bf16.mxu1 %v3617_v0 }
 0x1f8   :  { %3098 = vmatpush3.bf16.msra.mxu1 %v3618_v1 }
 0x1f9   :  { %3099 = vmatprep.subr.bf16.mxu1 %v3619_v2 }
 0x1fc   :  { %3100 = vmatpush3.bf16.msra.mxu1 %v3620_v3 }
 0x1fd   :  { %3101 = vmatprep.subr.bf16.mxu1 %v3621_v4 }
 0x200   :  { %3102 = vmatpush3.bf16.msra.mxu1 %v3622_v5 }
 0x201   :  { %3103 = vmatprep.subr.bf16.mxu1 %v3623_v8 }
 0x204   :  { %3104 = vmatpush3.bf16.msra.mxu1 %v3624_v9 }
 0x216   :  { %v2167_v17 = vpop.f32.mrb[4].mxu0 }
 0x217   :  { %v3117_v18 = vadd.f32 %v2167_v17, %v333_v15  ;;  %v2169_v14 = vpop.f32.mrb[5].mxu0 }
 0x218   :  { %v3118_v19 = vadd.f32 %v2169_v14, %v337_v16  ;;  %v2171_v20 = vpop.f32.mrb[6].mxu0 }
 0x219   :  { %3633 = vtanh.f32 %v3117_v18  ;;  %v2172_v21 = vpop.f32.mrb[7].mxu0 }
 0x21a   :  { %3635 = vtanh.f32 %v3118_v19 }
 0x223   :  { %v3634_v22 = vpop.eup %3633 }
 0x224   :  { %v3636_v23 = vpop.eup %3635  ;;  %v2184_v25 = vpack.c.bf16 %v3634_v22, %v3634_v22 }
 0x225   :  { %v2185_v24 = vpack.c.bf16 %v3636_v23, %v3636_v23 }
 0x227   :  { %2689 = vmatprep.mubr.bf16.mxu1 %v2185_v24 }
 0x228   :  { %2690 = vmatmul.mubr.bf16.vlgmr.msra.gmra.mrb[16].mxu1 %v2184_v25 }
 0x23b   :  { %v3061_v47 = vpop.f32.mrb[8].mxu1 }
 0x23c   :  { %v3062_v11 = vpop.f32.mrb[9].mxu1 }
 0x23d   :  { %v3063_v6 = vadd.f32 %v3062_v11, %v3061_v47  ;;  %v3064_v26 = vpop.f32.mrb[10].mxu1 }
 0x23e   :  { %v3065_v27 = vpop.f32.mrb[11].mxu1 }
 0x23f   :  { %v2612_v28 = vadd.f32 %v3063_v6, %v2996_v13 }
 0x2ba   :  { %v3083_v7 = vpop.f32.mrb[12].mxu1 }
 0x2bb   :  { %v3084_v34 = vpop.f32.mrb[13].mxu1 }
 0x2bc   :  { %v3085_v29 = vadd.f32 %v3084_v34, %v3083_v7  ;;  %v3086_v51 = vpop.f32.mrb[14].mxu1 }
 0x2bd   :  { %v3087_v30 = vpop.f32.mrb[15].mxu1 }
 0x2be   :  { %v2652_v31 = vadd.f32 %v3085_v29, %v2612_v28 }
 0x2fb   :  { %v3105_v32 = vpop.f32.mrb[16].mxu1 }
 0x2fc   :  { %v3106_v33 = vpop.f32.mrb[17].mxu1 }
 0x2fd   :  { %v3107_v35 = vadd.f32 %v3106_v33, %v3105_v32  ;;  %v3108_v36 = vpop.f32.mrb[18].mxu1 }
 0x2fe   :  { %v3109_v37 = vpop.f32.mrb[19].mxu1 }
 0x2ff   :  { %v2692_v38 = vadd.f32 %v3107_v35, %v2652_v31 }
 0x301   :  { %2697 = vst [vmem:[%s4756_s5] sm:$0xff] %v2692_v38 }

</bundles_post_ra>
